<compile_context>
chip_gen: v6e
topology: v6e:2x2x1
jax: 0.10.0
libtpu: 0.0.40
codegen_flags: <defaults>
</compile_context>

<pallas_src>
import functools

import numpy as np

import jax
import jax.numpy as jnp
from jax.experimental import pallas as pl
from jax.experimental.pallas import tpu as pltpu


def _focal_loss_kernel(tgt_ref, logit_ref, out_ref, *,
                       num_class, gamma, smooth, alpha, s_actual, tr):
    j = pl.program_id(1)

    # One unpack per tile: narrow (int8/int16) target -> int32 for the compares.
    t = tgt_ref[0].astype(jnp.int32)                       # (tr, 128)

    lo = smooth / (num_class - 1) if num_class > 1 else 0.0
    hi = 1.0 - smooth

    # Unrolled reduce over the small C axis on lane-dense (tr, 128) tiles.
    # One shared mask per class drives both the x_t select and the alpha select.
    x0 = logit_ref[0, 0].astype(jnp.float32)
    x_t = jnp.where(t == 0, x0, 0.0)
    x_sum = x0 if smooth != 0.0 else None
    a_t = jnp.full(t.shape, jnp.float32(alpha[0])) if alpha is not None else None
    for cc in range(1, num_class):
        xc = logit_ref[0, cc].astype(jnp.float32)
        m = t == cc
        x_t = jnp.where(m, xc, x_t)
        if smooth != 0.0:
            x_sum = x_sum + xc
        if alpha is not None:
            a_t = jnp.where(m, jnp.float32(alpha[cc]), a_t)

    if smooth != 0.0:
        # pt = sum_c clamp(one_hot, lo, hi)[c] * x[c] + smooth
        #    = lo * x_sum + (hi - lo) * x_t + smooth
        pt = lo * x_sum + (hi - lo) * x_t + smooth
    else:
        pt = x_t                                           # smooth==0 fast path

    logpt = jnp.log(pt)

    if gamma == 0.0:
        contrib = logpt
    elif gamma == 1.0:
        contrib = (1.0 - pt) * logpt
    elif gamma == 2.0:
        omp = 1.0 - pt
        contrib = omp * omp * logpt
    else:
        contrib = jnp.power(1.0 - pt, gamma) * logpt       # == -loss; sign in wrapper

    if alpha is not None:                                  # static: skipped when None
        contrib = contrib * a_t

    def _store(v):
        # Lane-dense (8,128) store of the per-tile partial sum (single XLU reduce).
        out_ref[...] = jnp.full(out_ref.shape, jnp.sum(v), jnp.float32)

    ragged = (s_actual % (tr * 128)) != 0                  # static
    if ragged:
        last = pl.num_programs(1) - 1

        @pl.when(j != last)
        def _():
            _store(contrib)

        @pl.when(j == last)
        def _():
            # Mask covers both the 128-pad of S and out-of-bounds rows of the
            # last tile; applied BEFORE the reduce so OOB garbage never lands
            # in the partial sum.
            row = jax.lax.broadcasted_iota(jnp.int32, contrib.shape, 0)
            lane = jax.lax.broadcasted_iota(jnp.int32, contrib.shape, 1)
            flat = (j * tr + row) * 128 + lane
            _store(jnp.where(flat < s_actual, contrib, 0.0))
    else:
        _store(contrib)


def _pick_tr(r, c, logit_itemsize, pack, block_bytes):
    """Rows-of-128 per tile: multiple of `pack` giving ~block_bytes logit blocks."""
    per_row = max(1, c * 128 * logit_itemsize)
    tr = block_bytes // per_row
    tr = max(pack, (tr // pack) * pack)
    return min(r, tr)


def focal_loss(logit, target, *, apply_nonlin=None, alpha=None, gamma=1.0,
               balance_index=0, smooth=1e-5, size_average=True,
               block_bytes=6 << 20):
    """JAX/Pallas equivalent of FocalLoss.forward."""
    if smooth is None:
        smooth = 0.0
    if smooth < 0 or smooth > 1.0:
        raise ValueError('smooth value should be in [0,1]')
    if apply_nonlin is not None:
        logit = apply_nonlin(logit)

    c = logit.shape[1]

    # Flatten all spatial dims to one contiguous S axis (free for NCHW row-major).
    if logit.ndim == 2:
        n = 1
        x = jnp.transpose(logit, (1, 0)).reshape(1, c, -1)   # tiny classification case
    else:
        n = logit.shape[0]
        x = logit.reshape(n, c, -1)
    s = x.shape[-1]

    # Target -> (N, S); remap 225 -> 0 (verbatim) and downcast to the narrowest
    # int dtype that holds num_class (cuts target HBM traffic 2-4x vs int32).
    # TODO(synk): source remaps label 225 (likely a typo of ignore-index 255) to
    # class 0 and *includes* those pixels in the loss; kept verbatim.
    t = target
    if t.ndim > 1 and t.shape[1] == 1:
        t = jnp.squeeze(t, axis=1)
    t = t.reshape(n, s)
    t = jnp.where(t == 225, 0, t)
    if c <= 127:
        t = t.astype(jnp.int8)
    elif c <= 32767:
        t = t.astype(jnp.int16)
    else:
        t = t.astype(jnp.int32)

    # Lane-align the spatial axis: (N, C, S) -> (N, C, R, 128).  Free reshape
    # when S % 128 == 0; otherwise pad S once (one contiguous copy, still far
    # cheaper than 128/W-inflated per-tile DMA of narrow rows).
    s_pad = ((s + 127) // 128) * 128
    if s_pad != s:
        x = jnp.pad(x, ((0, 0), (0, 0), (0, s_pad - s)))
        t = jnp.pad(t, ((0, 0), (0, s_pad - s)))
    r = s_pad // 128
    x = x.reshape(n, c, r, 128)
    t = t.reshape(n, r, 128)

    # alpha resolved at trace time (mirrors the torch branches) -> constants
    # baked into the kernel; no extra input / gather when alpha is None.
    if alpha is None:
        alpha_c = None
    elif isinstance(alpha, (list, tuple, np.ndarray)):
        a = np.asarray(alpha, dtype=np.float64).reshape(-1)
        assert a.size == c
        a = a / a.sum()
        a = 1.0 / a
        alpha_c = tuple(float(v) for v in a)
    elif isinstance(alpha, float):
        a = np.ones((c,), np.float64) * (1.0 - alpha)
        a[balance_index] = alpha
        alpha_c = tuple(float(v) for v in a)
    else:
        raise TypeError('Not support alpha type')

    logit_itemsize = jnp.dtype(x.dtype).itemsize
    tgt_itemsize = jnp.dtype(t.dtype).itemsize
    logit_pack = max(8, 32 // logit_itemsize)
    tgt_pack = max(8, 32 // tgt_itemsize)
    pack = max(logit_pack, tgt_pack)
    tr = _pick_tr(r, c, logit_itemsize, pack, block_bytes)
    nr = pl.cdiv(r, tr)

    # Explicit scoped-VMEM budget from padded-byte accounting of the resident
    # buffers (2x logit block + 2x target block + tiny output blocks) + headroom.
    def _rup(v, m):
        return ((v + m - 1) // m) * m
    logit_blk = c * _rup(tr, logit_pack) * 128 * logit_itemsize
    tgt_blk = _rup(tr, tgt_pack) * 128 * tgt_itemsize
    vmem_limit = int(2 * logit_blk + 2 * tgt_blk + (4 << 20))

    kernel = functools.partial(
        _focal_loss_kernel, num_class=c, gamma=float(gamma),
        smooth=float(smooth), alpha=alpha_c, s_actual=s, tr=tr)

    partial = pl.pallas_call(
        kernel,
        out_shape=jax.ShapeDtypeStruct((n, nr, 8, 128), jnp.float32),
        grid_spec=pltpu.PrefetchScalarGridSpec(
            num_scalar_prefetch=0,
            grid=(n, nr),
            in_specs=[
                pl.BlockSpec((1, tr, 128), lambda i, j: (i, j, 0)),        # target (N,R,128)
                pl.BlockSpec((1, c, tr, 128), lambda i, j: (i, 0, j, 0)),  # logit (N,C,R,128)
            ],
            out_specs=pl.BlockSpec((1, 1, 8, 128), lambda i, j: (i, j, 0, 0)),
        ),
        compiler_params=pltpu.CompilerParams(
            dimension_semantics=("parallel", "parallel"),
            vmem_limit_bytes=vmem_limit),
    )(t, x)

    total = -jnp.sum(partial[:, :, 0, 0])    # loss = -alpha * (1-pt)^g * log(pt)
    if size_average:
        total = total / jnp.float32(n * s)
    return total


def focal_loss_ref(logit, target, *, alpha=None, gamma=1.0, balance_index=0,
                   smooth=1e-5, size_average=True):
    """Pure-JAX mirror of the PyTorch forward (correctness reference)."""
    c = logit.shape[1]
    if logit.ndim > 2:
        x = jnp.moveaxis(logit.reshape(logit.shape[0], c, -1), 1, -1).reshape(-1, c)
    else:
        x = logit
    x = x.astype(jnp.float32)
    t = target.reshape(-1).astype(jnp.int32)
    t = jnp.where(t == 225, 0, t)
    if alpha is None:
        a = jnp.ones((c,), jnp.float32)
    elif isinstance(alpha, (list, tuple, np.ndarray)):
        a = jnp.asarray(alpha, jnp.float32)
        a = a / a.sum()
        a = 1.0 / a
    else:
        a = jnp.ones((c,), jnp.float32) * (1.0 - alpha)
        a = a.at[balance_index].set(alpha)
    one_hot = jax.nn.one_hot(t, c, dtype=jnp.float32)
    if smooth:
        one_hot = jnp.clip(one_hot, smooth / (c - 1), 1.0 - smooth)
    pt = jnp.sum(one_hot * x, axis=1) + smooth
    logpt = jnp.log(pt)
    loss = -a[t] * jnp.power(1.0 - pt, gamma) * logpt
    return loss.mean() if size_average else loss.sum()


if __name__ == "__main__":
    key = jax.random.PRNGKey(0)
    keys = jax.random.split(key, 8)

    # Module default has apply_nonlin=None and takes log(pt), so feed
    # probability-like values in (0, 1), matching how the loss is normally used.
    N, C, H, W = 2, 4, 16, 16
    logit = jax.random.uniform(keys[0], (N, C, H, W), jnp.float32, minval=0.05, maxval=0.95)
    target = jax.random.randint(keys[1], (N, 1, H, W), 0, C, dtype=jnp.int32)

    # Case 1: module defaults (alpha=None, gamma=1, smooth=1e-5, mean).
    # S=256 -> free lane-dense reshape, no padding, no masking.
    out1 = jax.block_until_ready(focal_loss(logit, target))
    ref1 = focal_loss_ref(logit, target)
    assert jnp.isfinite(out1)
    assert jnp.allclose(out1, ref1, rtol=1e-4, atol=1e-5), (out1, ref1)

    # Case 2: per-class alpha list, gamma=2 fast path, sum reduction.
    a_list = [1.0, 2.0, 3.0, 4.0]
    out2 = jax.block_until_ready(
        focal_loss(logit, target, alpha=a_list, gamma=2.0, size_average=False))
    ref2 = focal_loss_ref(logit, target, alpha=a_list, gamma=2.0, size_average=False)
    assert jnp.allclose(out2, ref2, rtol=1e-4, atol=1e-4), (out2, ref2)

    # Case 3: S = H*W not a multiple of 128 -> one-time pad + in-kernel lane mask.
    H2 = 20
    logit2 = jax.random.uniform(keys[2], (N, C, H2, W), jnp.float32, minval=0.05, maxval=0.95)
    target2 = jax.random.randint(keys[3], (N, 1, H2, W), 0, C, dtype=jnp.int32)
    out3 = jax.block_until_ready(focal_loss(logit2, target2))
    ref3 = focal_loss_ref(logit2, target2)
    assert jnp.allclose(out3, ref3, rtol=1e-4, atol=1e-5), (out3, ref3)

    # Case 4: ragged ROW tiling (R=40 rows of 128, tr=32 forced by small block_bytes,
    # last tile masked) + float alpha + non-integer gamma power path.
    H3, W3 = 40, 128
    logit3 = jax.random.uniform(keys[4], (N, C, H3, W3), jnp.float32, minval=0.05, maxval=0.95)
    target3 = jax.random.randint(keys[5], (N, 1, H3, W3), 0, C, dtype=jnp.int32)
    out4 = jax.block_until_ready(
        focal_loss(logit3, target3, alpha=0.25, gamma=1.5, block_bytes=1 << 16))
    ref4 = focal_loss_ref(logit3, target3, alpha=0.25, gamma=1.5)
    assert jnp.allclose(out4, ref4, rtol=1e-4, atol=1e-5), (out4, ref4)

    # Case 5: bf16 logits (dtype-preserving DMA, per-tile upcast) + smooth=0 fast path.
    logit4 = logit.astype(jnp.bfloat16)
    out5 = jax.block_until_ready(focal_loss(logit4, target, smooth=0.0, gamma=2.0))
    ref5 = focal_loss_ref(logit4.astype(jnp.float32), target, smooth=0.0, gamma=2.0)
    assert jnp.allclose(out5, ref5, rtol=1e-3, atol=1e-3), (out5, ref5)

    print("KERNEL_OK")
</pallas_src>

<mosaic_0001>
module attributes {stable_mosaic.version = 11 : i64} {
  func.func @_focal_loss_kernel(%arg0: i32, %arg1: i32, %arg2: memref<1x2x128xi8, #tpu.memory_space<vmem>>, %arg3: memref<1x4x2x128xf32, #tpu.memory_space<vmem>>, %arg4: memref<1x1x8x128xf32, #tpu.memory_space<vmem>>) attributes {dimension_semantics = [#tpu.dimension_semantics<parallel>, #tpu.dimension_semantics<parallel>], iteration_bounds = array<i64: 2, 1>, scalar_prefetch = 0 : i64, scratch_operands = 0 : i64, tpu.core_type = #tpu.core_type<tc>, window_params = [{transform_indices = @transform_0, window_bounds = array<i64: 1, 2, 128>}, {transform_indices = @transform_1, window_bounds = array<i64: 1, 4, 2, 128>}, {transform_indices = @transform_2, window_bounds = array<i64: 1, 1, 8, 128>}]} {
    %c0 = arith.constant 0 : index
    %c0_0 = arith.constant 0 : index
    %c0_1 = arith.constant 0 : index
    %0 = vector.load %arg2[%c0, %c0_0, %c0_1] : memref<1x2x128xi8, #tpu.memory_space<vmem>>, vector<1x2x128xi8>
    %1 = vector.shape_cast %0 : vector<1x2x128xi8> to vector<2x128xi8>
    %2 = arith.extsi %1 : vector<2x128xi8> to vector<2x128xi32>
    %c0_2 = arith.constant 0 : index
    %c0_3 = arith.constant 0 : index
    %c0_4 = arith.constant 0 : index
    %c0_5 = arith.constant 0 : index
    %3 = vector.load %arg3[%c0_2, %c0_3, %c0_4, %c0_5] : memref<1x4x2x128xf32, #tpu.memory_space<vmem>>, vector<1x1x2x128xf32>
    %4 = vector.shape_cast %3 : vector<1x1x2x128xf32> to vector<2x128xf32>
    %c0_i32 = arith.constant 0 : i32
    %5 = vector.broadcast %c0_i32 : i32 to vector<2x128xi32>
    %6 = arith.cmpi eq, %2, %5 : vector<2x128xi32>
    %cst = arith.constant 0.000000e+00 : f32
    %7 = vector.broadcast %cst : f32 to vector<2x128xf32>
    %8 = arith.select %6, %4, %7 : vector<2x128xi1>, vector<2x128xf32>
    %c0_6 = arith.constant 0 : index
    %c1 = arith.constant 1 : index
    %c0_7 = arith.constant 0 : index
    %c0_8 = arith.constant 0 : index
    %9 = vector.load %arg3[%c0_6, %c1, %c0_7, %c0_8] : memref<1x4x2x128xf32, #tpu.memory_space<vmem>>, vector<1x1x2x128xf32>
    %10 = vector.shape_cast %9 : vector<1x1x2x128xf32> to vector<2x128xf32>
    %c1_i32 = arith.constant 1 : i32
    %11 = vector.broadcast %c1_i32 : i32 to vector<2x128xi32>
    %12 = arith.cmpi eq, %2, %11 : vector<2x128xi32>
    %13 = arith.select %12, %10, %8 : vector<2x128xi1>, vector<2x128xf32>
    %14 = arith.addf %4, %10 : vector<2x128xf32>
    %c0_9 = arith.constant 0 : index
    %c2 = arith.constant 2 : index
    %c0_10 = arith.constant 0 : index
    %c0_11 = arith.constant 0 : index
    %15 = vector.load %arg3[%c0_9, %c2, %c0_10, %c0_11] : memref<1x4x2x128xf32, #tpu.memory_space<vmem>>, vector<1x1x2x128xf32>
    %16 = vector.shape_cast %15 : vector<1x1x2x128xf32> to vector<2x128xf32>
    %c2_i32 = arith.constant 2 : i32
    %17 = vector.broadcast %c2_i32 : i32 to vector<2x128xi32>
    %18 = arith.cmpi eq, %2, %17 : vector<2x128xi32>
    %19 = arith.select %18, %16, %13 : vector<2x128xi1>, vector<2x128xf32>
    %20 = arith.addf %14, %16 : vector<2x128xf32>
    %c0_12 = arith.constant 0 : index
    %c3 = arith.constant 3 : index
    %c0_13 = arith.constant 0 : index
    %c0_14 = arith.constant 0 : index
    %21 = vector.load %arg3[%c0_12, %c3, %c0_13, %c0_14] : memref<1x4x2x128xf32, #tpu.memory_space<vmem>>, vector<1x1x2x128xf32>
    %22 = vector.shape_cast %21 : vector<1x1x2x128xf32> to vector<2x128xf32>
    %c3_i32 = arith.constant 3 : i32
    %23 = vector.broadcast %c3_i32 : i32 to vector<2x128xi32>
    %24 = arith.cmpi eq, %2, %23 : vector<2x128xi32>
    %25 = arith.select %24, %22, %19 : vector<2x128xi1>, vector<2x128xf32>
    %26 = arith.addf %20, %22 : vector<2x128xf32>
    %cst_15 = arith.constant 3.33333332E-6 : f32
    %27 = vector.broadcast %cst_15 : f32 to vector<2x128xf32>
    %28 = arith.mulf %27, %26 : vector<2x128xf32>
    %cst_16 = arith.constant 0.999986648 : f32
    %29 = vector.broadcast %cst_16 : f32 to vector<2x128xf32>
    %30 = arith.mulf %29, %25 : vector<2x128xf32>
    %31 = arith.addf %28, %30 : vector<2x128xf32>
    %cst_17 = arith.constant 9.99999974E-6 : f32
    %32 = vector.broadcast %cst_17 : f32 to vector<2x128xf32>
    %33 = arith.addf %31, %32 : vector<2x128xf32>
    %34 = math.log %33 : vector<2x128xf32>
    %cst_18 = arith.constant 1.000000e+00 : f32
    %35 = vector.broadcast %cst_18 : f32 to vector<2x128xf32>
    %36 = arith.subf %35, %33 : vector<2x128xf32>
    %37 = arith.mulf %36, %34 : vector<2x128xf32>
    %38 = vector.shape_cast %37 : vector<2x128xf32> to vector<1x2x128xf32>
    %cst_19 = arith.constant dense<0.000000e+00> : vector<1xf32>
    %39 = vector.multi_reduction <add>, %38, %cst_19 [1, 2] : vector<1x2x128xf32> to vector<1xf32>
    %40 = vector.shape_cast %39 : vector<1xf32> to vector<1x1x1xf32>
    %41 = vector.extract %40[0, 0, 0] : f32 from vector<1x1x1xf32>
    %42 = vector.broadcast %41 : f32 to vector<1x1x8x128xf32>
    %c0_20 = arith.constant 0 : index
    %c0_21 = arith.constant 0 : index
    %c0_22 = arith.constant 0 : index
    %c0_23 = arith.constant 0 : index
    %43 = vector.load %arg4[%c0_20, %c0_21, %c0_22, %c0_23] : memref<1x1x8x128xf32, #tpu.memory_space<vmem>>, vector<1x1x8x128xf32>
    tpu.vector_store %arg4[%c0_20, %c0_21, %c0_22, %c0_23], %42 {strides = array<i32>} : memref<1x1x8x128xf32, #tpu.memory_space<vmem>>, vector<1x1x8x128xf32>,
    return
  }
  func.func @transform_0(%arg0: i32, %arg1: i32) -> (i32, i32, i32) {
    %c0_i32 = arith.constant 0 : i32
    %c0_i32_0 = arith.constant 0 : i32
    return %arg0, %arg1, %c0_i32 : i32, i32, i32
  }
  func.func @transform_1(%arg0: i32, %arg1: i32) -> (i32, i32, i32, i32) {
    %c0_i32 = arith.constant 0 : i32
    %c0_i32_0 = arith.constant 0 : i32
    %c0_i32_1 = arith.constant 0 : i32
    return %arg0, %c0_i32, %arg1, %c0_i32_0 : i32, i32, i32, i32
  }
  func.func @transform_2(%arg0: i32, %arg1: i32) -> (i32, i32, i32, i32) {
    %c0_i32 = arith.constant 0 : i32
    %c0_i32_0 = arith.constant 0 : i32
    %c0_i32_1 = arith.constant 0 : i32
    return %arg0, %arg1, %c0_i32, %c0_i32_0 : i32, i32, i32, i32
  }
}

</mosaic_0001>

<bundles_post_ra>
// kernel: tpu_custom_call.1
= control target key start
LH: loop header
LB: loop body
LE: loop exit
PB: predicated region body
PF: predicated region fallthrough
CT: control target
= control target key end

     0   :  { %7 = vsyncpa [#allocation3], 0  ;;  %s802_s0 = inlined_call_operand.hbm [shape: s8[2,2,128], index: 0, kind: input, shape index: {}]   ;;  %s803_s1 = inlined_call_operand.hbm [shape: f32[2,4,2,128], index: 1, kind: input, shape index: {}]   ;;  %s804_s2 = inlined_call_operand.hbm [shape: f32[2,1,8,128], index: 2, kind: output, shape index: {}]  }
   0x1   :  { %9 = vsyncpa [#allocation3 + $0x1], 0 }
   0x2   :  { %10 = vsyncpa [#allocation6], 0 }
   0x3   :  { %12 = vsyncpa [#allocation6 + $0x1], 0 }
   0x4   :  { %13 = vsyncpa [#allocation4], 0 }
   0x5   :  { %15 = vsyncpa [#allocation4 + $0x1], 0  ;;  %s628_s9 = smov 0   ;;  %s630_s10 = smov 0  }
   0x6   :  { %s632_s11 = smov 0   ;;  %s634_s12 = smov 0  }
   0x7   :  { %s636_s13 = smov 0   ;;  %s638_s14 = smov 0  }
   0x8 LB: > { %s374_s15 = sadd.s32 4294967295, %s606_s14   ;;  %s375_s16 = sadd.s32 4294967294, %s606_s14   ;;  %s606_s14 = sphi %s638_s14, %s21_s14   ;;  %s602_s13 = sphi %s636_s13, %s816_s13   ;;  %s598_s12 = sphi %s634_s12, %s815_s12   ;;  %s594_s11 = sphi %s632_s11, %s814_s11   ;;  %s590_s10 = sphi %s630_s10, %s813_s10   ;;  %s586_s9 = sphi %s628_s9, %s812_s9  }
   0x9   : > { %s33_s17 = sadd.s32 1, %s602_s13  ;;  %s42_s18 = sadd.s32 1, %s594_s11 }
   0xa   : > { %p35_p0 = scmp.ge.s32.totalorder %s33_s17, 2  ;;  %p49_p1 = scmp.ne.s32.totalorder %s594_s11, %s590_s10 }
   0xb   : > { %p50_p2 = scmp.eq.s32.totalorder %s606_s14, 0  ;;  %p55_p3 = scmp.ne.s32.totalorder %s590_s10, %s586_s9 }
   0xc   : > { %s818_s17 = smov (%p35_p0, %s33_s17), 0  ;;  %p56_p5 = scmp.eq.s32.totalorder %s374_s15, 0 }
   0xd   : > { %p669_p4 = por %p50_p2, %p49_p1  ;;  %s37_s20 = ssub.s32 %s602_s13, %s818_s17 }
   0xe   : > { %p109_p6 = scmp.eq.s32.totalorder %s374_s15, 1  ;;  %p40_p7 = scmp.eq.s32.totalorder %s37_s20, 0 }
   0xf   : > { %p675_p8 = por %p56_p5, %p55_p3  ;;  %p115_p10 = scmp.eq.s32.totalorder %s375_s16, 1 }
  0x10   : > { %p679_p9 = por %p109_p6, %p49_p1  ;;  %p412_p13 = scmp.lt.s32.totalorder %s606_s14, 2 }
  0x11   : > { %s684_s23 = scalar_select %p40_p7, %s594_s11, %s42_s18  }
  0x12   : > { %p686_p11 = por %p115_p10, %p55_p3  ;;  %s693_s25 = sand.u32 1, %s594_s11  }
  0x13   : > { %s378_s26 = sshll.u32 %s602_s13, 4  ;;  %s138_s27 = scalar_lea.vmem [#allocation2], %s693_s25 }
  0x14   : > { %s146_s28 = sshll.u32 %s138_s27, 4  ;;  %s144_s3 = scalar_lea.hbm %s802_s0, %s378_s26  ;;  %s147_s28 = int_to_ptr.vmem [resolvable:$true] %s146_s28 }
  0x15   : > { %p702_p0 = pnand %p412_p13, %p669_p4  ;;  %p382_p1 = scmp.ge.s32.totalorder %s606_s14, 1 }
  0x16   : > { %p173_p2 = scmp.lt.s32.totalorder %s606_s14, 3  ;;  %s379_s5 = sshll.u32 %s693_s25, 3 }
  0x17   : > { %s136_s6 = scalar_lea.sflag [#allocation3], %s693_s25  ;;  %p468_p3 = pneg %p702_p0 }
  0x18   : > { %s479_s7 = scalar_lea.vmem %s147_s28, 16  ;;  %s608_s8 = smov [#allocation2]  }
  0x19   : > { %p480_p5 = scmp.ne.s32.totalorder %s147_s28, %s479_s7  ;;  %s484_s15 = sshll.u32 %s608_s8, 4  ;;  %s485_s15 = int_to_ptr.vmem [resolvable:$false] %s484_s15 }
  0x1a   : > { %s486_s16 = scalar_lea.vmem %s485_s15, 32  ;;  %p487_p4 = scmp.lt.s32.totalorder %s147_s28, %s485_s15 }
  0x1b   : > { %p482_p6 = pnand %p480_p5, %p468_p3  ;;  %p488_p10 = scmp.lt.s32.totalorder %s486_s16, %s479_s7 }
  0x1d   : > { %p483_p7 = pneg %p482_p6  ;;  %p489_p13 = por %p488_p10, %p487_p4 }
  0x1f   : > { %p490_p12 = pnand %p489_p13, %p483_p7 }
  0x21   : > { %493 = shalt.err (!%p490_p12)
}
  0x22   : > { %404 = dma.hbm_to_vmem [thread:$0]  (!%p702_p0), %s144_s3, 16, %s147_s28, %s136_s6  }
  0x23   : > { %p721_p5 = pnand %p382_p1, %p173_p2  ;;  %s392_s19 = sshll.u32 %s602_s13, 7 }
  0x24   : > { %s157_s20 = scalar_lea.vmem [#allocation5], %s379_s5  ;;  %s164_s30 = scalar_lea.hbm %s803_s1, %s392_s19 }
  0x25   : > { %s165_s26 = sshll.u32 %s157_s20, 4  ;;  %s154_s7 = scalar_lea.sflag [#allocation6], %s693_s25  ;;  %s166_s26 = int_to_ptr.vmem [resolvable:$true] %s165_s26 }
  0x26   : > { %s507_s8 = scalar_lea.vmem %s166_s26, 128  ;;  %s609_s28 = smov [#allocation5]  }
  0x27   : > { %p508_p12 = scmp.ne.s32.totalorder %s166_s26, %s507_s8  ;;  %s512_s3 = sshll.u32 %s609_s28, 4  ;;  %s513_s3 = int_to_ptr.vmem [resolvable:$false] %s512_s3 }
  0x28   : > { %s514_s6 = scalar_lea.vmem %s513_s3, 256  ;;  %p515_p1 = scmp.lt.s32.totalorder %s166_s26, %s513_s3 }
  0x29   : > { %p510_p6 = pnand %p508_p12, %p468_p3  ;;  %p516_p2 = scmp.lt.s32.totalorder %s514_s6, %s507_s8 }
  0x2b   : > { %p511_p7 = pneg %p510_p6  ;;  %p517_p4 = por %p516_p2, %p515_p1 }
  0x2d   : > { %p518_p10 = pnand %p517_p4, %p511_p7 }
  0x2f   : > { %521 = shalt.err (!%p518_p10)
}
  0x30   : > { %s610_s5 = smov 32   ;;  %s611_s15 = smov 2  }
  0x31   : > { %407 = dma.hbm_to_vmem [thread:$0]  (!%p702_p0), %s164_s30, 128, %s166_s26, %s154_s7, %s610_s5, %s610_s5, %s611_s15  }
  0x32   : > { %177 = sbr.rel (%p721_p5) target bundleno = 306 (0x132), region = 28  ;;  %s738_s25 = sand.u32 (!%p721_p5), 1, %s590_s10  }
  0x33   : > { %s180_s16 = scalar_lea.sflag (!%p721_p5), [#allocation3], %s738_s25  ;;  %s182_s19 = scalar_lea.vmem (!%p721_p5), [#allocation2], %s738_s25 }
  0x37   : > { %573 = dma.done.wait (%p675_p8), %s180_s16, 16  }
  0x38   : > { %575 = vsyncadd (%p675_p8), %s180_s16, 4294967280  ;;  %s383_s4 = sshll.u32 %s738_s25, 3  ;;  %s188_s18 = scalar_lea.sflag [#allocation6], %s738_s25 }
  0x39   : > { %s191_s20 = scalar_lea.vmem [#allocation5], %s383_s4 }
  0x3a   : > { %577 = dma.done.wait (%p675_p8), %s188_s18, 128  }
  0x3b   : > { %579 = vsyncadd (%p675_p8), %s188_s18, 4294967168  ;;  %v216_v0 = vld [vmem:[%s182_s19] sm:$0x1]  ;;  %v218_v1 = vld [vmem:[%s191_s20] sm:$0x3]  ;;  %vm244_vm4 = vcmask 1041408  }
  0x3c   : > { %v385_v2 = vld [vmem:[%s191_s20 + $0x2] sm:$0x3]  ;;  %v217_v3 = vunpack.c.0.s8 %v216_v0  ;;  %v386_v5 = vld [vmem:[%s191_s20 + $0x4] sm:$0x3]  ;;  %v387_v6 = vld [vmem:[%s191_s20 + $0x6] sm:$0x3] }
  0x3d   : > { %v225_v4 = vadd.f32 %v385_v2, %v218_v1  ;;  %s215_s21 = scalar_lea.vmem [#allocation7], %s383_s4  ;;  %s389_s27 = sshll.u32 %s598_s12, 7 }
  0x3e   : > { %vm219_vm0 = vcmp.eq.s32.totalorder %v217_v3, 0  ;;  %vm223_vm1 = vcmp.eq.s32.totalorder %v217_v3, 1  ;;  %vm228_vm2 = vcmp.eq.s32.totalorder %v217_v3, 2  ;;  %vm233_vm3 = vcmp.eq.s32.totalorder %v217_v3, 3  ;;  %s272_s26 = sshll.u32 %s215_s21, 4  ;;  %s270_s8 = scalar_lea.hbm %s804_s2, %s389_s27  ;;  %s757_s26 = int_to_ptr.vmem [resolvable:$true] %s272_s26 }
  0x3f   : > { %v230_v7 = vadd.f32 %v386_v5, %v225_v4  ;;  %v220_v8 = vsel %vm219_vm0, %v218_v1, 0.0  ;;  %s258_s28 = scalar_lea.sflag [#allocation4], %s738_s25  ;;  %s522_s3 = scalar_lea.vmem %s757_s26, 128 }
  0x40   : > { %v224_v9 = vsel %vm223_vm1, %v385_v2, %v220_v8  ;;  %p523_p8 = scmp.ne.s32.totalorder %s757_s26, %s522_s3  ;;  %s612_s6 = smov [#allocation7]  }
  0x41   : > { %v235_v10 = vadd.f32 %v387_v6, %v230_v7  ;;  %v229_v11 = vsel %vm228_vm2, %v386_v5, %v224_v9  ;;  %s526_s12 = sshll.u32 %s612_s6, 4  ;;  %s527_s12 = int_to_ptr.vmem [resolvable:$false] %s526_s12 }
  0x42   : > { %v234_v12 = vsel %vm233_vm3, %v387_v6, %v229_v11  ;;  %p524_p0 = pnand %p523_p8, %p679_p9  ;;  %s528_s5 = scalar_lea.vmem %s527_s12, 256 }
  0x43   : > { %v236_v13 = vmul.f32 3.3333333e-06, %v235_v10  ;;  %v237_v14 = vmul.f32 0.99998665, %v234_v12  ;;  %p529_p13 = scmp.lt.s32.totalorder %s757_s26, %s527_s12  ;;  %p530_p5 = scmp.lt.s32.totalorder %s528_s5, %s522_s3 }
  0x44   : > { %p525_p3 = pneg %p524_p0 }
  0x45   : > { %v238_v15 = vadd.f32 %v237_v14, %v236_v13  ;;  %p531_p12 = por %p530_p5, %p529_p13 }
  0x47   : > { %v239_v16 = vadd.f32 1e-05, %v238_v15  ;;  %p532_p6 = pnand %p531_p12, %p525_p3 }
  0x49   : > { %464 = vlog2.f32 %v239_v16  ;;  %v242_v17 = vsub.f32 1.0, %v239_v16 }
  0x56   : > { %v465_v18 = vpop.eup %464 }
  0x57   : > { %v241_v19 = vmul.f32 0.6931472, %v465_v18 }
  0x59   : > { %v243_v20 = vmul.f32 %v242_v17, %v241_v19 }
  0x5b   : > { %v245_v21 = vsel %vm244_vm4, %v243_v20, 0.0 }
  0x5c   : > { %246 = vadd.xlane.f32.xlu0 %v245_v21 }
  0xe5   : > { %v247_v22 = vpop.xlane.xlu0 %246 }
  0xe6   : > { %v248_v23 = vrot.slane %v247_v22, 4 }
  0xe8   : > { %v249_v24 = vadd.f32 %v248_v23, %v247_v22 }
  0xea   : > { %v250_v25 = vrot.slane %v249_v24, 2 }
  0xec   : > { %v251_v26 = vadd.f32 %v250_v25, %v249_v24 }
  0xee   : > { %v252_v27 = vrot.slane %v251_v26, 1 }
  0xf0   : > { %v253_v28 = vadd.f32 %v252_v27, %v251_v26 }
  0xf2   : > { %393 = vpush %v253_v28 }
 0x123   : > { %s394_s29 = spop %393 }
 0x124   : > { %v255_v29 = vstv %s394_s29 }
 0x125   : > { %256 = vst [vmem:[%s215_s21] sm:$0xff] %v255_v29 }
 0x126   : > { %535 = shalt.err (!%p532_p6)
}
 0x127   : > { %s536_s15 = scalar_lea.hbm %s270_s8, 128  ;;  %s540_s19 = scalar_lea.hbm %s804_s2, 256 }
 0x128   : > { %p537_p7 = scmp.ne.s32.totalorder %s270_s8, %s536_s15  ;;  %p541_p4 = scmp.lt.s32.totalorder %s270_s8, %s804_s2 }
 0x129   : > { %p542_p10 = scmp.lt.s32.totalorder %s540_s19, %s536_s15 }
 0x12a   : > { %p538_p1 = pnand %p537_p7, %p679_p9 }
 0x12b   : > { %p543_p8 = por %p542_p10, %p541_p4 }
 0x12c   : > { %p539_p2 = pneg %p538_p1 }
 0x12e   : > { %p544_p0 = pnand %p543_p8, %p539_p2 }
 0x130   : > { %547 = shalt.err (!%p544_p0)
}
 0x131   : > { %399 = dma.vmem_to_hbm [thread:$0]  (%p679_p9), %s757_s26, 128, %s270_s8, %s258_s28  }
 0x132 PF: > { %s284_s20 = sand.u32 1, %s586_s9   ;;  %p811_p3 = scmp.ge.s32.totalorder %s606_s14, 2 }
 0x133   : > { %s285_s21 = scalar_lea.sflag [#allocation4], %s284_s20 }
 0x134   : > { %p409_p13 = pnand %p811_p3, %p686_p11 }
 0x136   : > { %p410_p5 = pneg %p409_p13 }
 0x138   : > { %581 = dma.done.wait (%p410_p5), %s285_s21, 128  }
 0x139   : > { %583 = vsyncadd (%p410_p5), %s285_s21, 4294967168  ;;  %s21_s14 = sadd.s32 1, %s606_s14   ;;  %s812_s9 = smov %s590_s10 }
 0x13a   : > { %p18_p12 = scmp.ge.s32.totalorder %s21_s14, 4   ;;  %s813_s10 = smov %s594_s11 }
 0x13b   : > { %s814_s11 = smov %s684_s23  ;;  %s815_s12 = smov %s602_s13 }
 0x13c   : > { %s816_s13 = smov %s818_s17  ;;  %20 = sbr.rel (!%p18_p12) target bundleno = 8 (0x8), region = 89 }
 0x141   :  { %290 = vsyncpa [#allocation3], 1 }
 0x142   :  { %292 = vsyncpa [#allocation3 + $0x1], 1 }
 0x143   :  { %293 = vsyncpa [#allocation6], 1 }
 0x144   :  { %295 = vsyncpa [#allocation6 + $0x1], 1 }
 0x145   :  { %296 = vsyncpa [#allocation4], 1 }
 0x146   :  { %298 = vsyncpa [#allocation4 + $0x1], 1 }

</bundles_post_ra>
